<compile_context>
chip_gen: v7x
topology: tpu7x:2x2x1
jax: 0.10.0
libtpu: 0.0.40
codegen_flags: <defaults>
</compile_context>

<pallas_src>
import functools

import jax
import jax.numpy as jnp
from jax import lax
from jax.experimental import pallas as pl
from jax.experimental.pallas import tpu as pltpu

_LANE = 128


def _pad_to(n, mult):
    return ((n + mult - 1) // mult) * mult


def _pick_tile(dim, cap, mult):
    """Largest multiple of `mult` <= cap that divides `dim`; `dim` itself when
    it already fits under the cap (single block)."""
    if dim <= cap:
        return dim
    t = (cap // mult) * mult
    while t >= mult:
        if dim % t == 0:
            return t
        t -= mult
    return dim  # dim > cap and not 128-divisible: fall back to a single block


def _default_caps():
    """Generation-keyed tile caps / VMEM budget (v7x has 64 MiB, v5e/v6e 128)."""
    try:
        vmem = pltpu.get_tpu_info().vmem_capacity_bytes
    except Exception:
        vmem = 64 * 1024 * 1024
    if vmem >= 128 * 1024 * 1024:  # v5e / v6e
        return dict(tm_cap=1024, tn_cap=512, tk_cap=1024,
                    vmem_limit_bytes=96 * 1024 * 1024)
    return dict(tm_cap=512, tn_cap=512, tk_cap=512,  # v7x: stay under ~48 MiB
                vmem_limit_bytes=48 * 1024 * 1024)


# ----------------------------------------------------------------------------
# Per-layer kernels (general path, used when the fused path would not fit)
# ----------------------------------------------------------------------------

def _linear_nosplit_kernel(x_ref, w_ref, b_ref, o_ref, *, apply_relu):
    """o = x @ W.T + b (+ReLU), single K step -> no accumulator scratch.

    x_ref: (TM, K)  w_ref: (TN, K)  b_ref: (1, TN)  o_ref: (TM, TN)
    """
    # Contract x's last dim with W's last dim (trans_b matmul): W is consumed
    # in its native (N, K) layout, no wrapper-side transpose.
    # TODO(synk): check the Mosaic dump for a per-tile vxpose of the W block;
    # if present, pre-transpose W once in the wrapper instead.
    out = lax.dot_general(
        x_ref[...], w_ref[...],
        dimension_numbers=(((1,), (1,)), ((), ())),
        preferred_element_type=jnp.float32,
    )
    out = out + b_ref[...].astype(jnp.float32)  # f32 epilogue (v5e-safe)
    if apply_relu:
        out = jnp.maximum(out, 0.0)
    o_ref[...] = out.astype(o_ref.dtype)


def _linear_ksplit_kernel(x_ref, w_ref, b_ref, o_ref, acc_ref, *, apply_relu):
    """Same, but reduced over a K grid axis with an f32 VMEM accumulator."""
    k = pl.program_id(2)

    @pl.when(k == 0)
    def _():
        acc_ref[...] = jnp.zeros_like(acc_ref)

    acc_ref[...] += lax.dot_general(
        x_ref[...], w_ref[...],
        dimension_numbers=(((1,), (1,)), ((), ())),
        preferred_element_type=jnp.float32,
    )

    @pl.when(k == pl.num_programs(2) - 1)
    def _():
        out = acc_ref[...] + b_ref[...].astype(jnp.float32)
        if apply_relu:
            out = jnp.maximum(out, 0.0)
        o_ref[...] = out.astype(o_ref.dtype)


def linear_pallas(x2d, w, b, *, apply_relu=False, out_dtype=None,
                  tm_cap=512, tn_cap=512, tk_cap=512,
                  vmem_limit_bytes=48 * 1024 * 1024):
    """y = x2d @ w.T + b (+ optional ReLU).

    x2d: (M, K), w: (N, K), b: (N,).  N should be a multiple of 128 for
    lane-dense stores (mlp_forward pads the weights once ahead of time).
    """
    M, K = x2d.shape
    N = w.shape[0]
    out_dtype = out_dtype or x2d.dtype

    TM = M if M <= tm_cap else tm_cap          # partial last tile is masked
    TN = _pick_tile(N, tn_cap, _LANE)
    TK = _pick_tile(K, tk_cap, _LANE)

    b2d = b.reshape(1, N)
    grid_mn = (pl.cdiv(M, TM), N // TN)

    if TK == K:
        # Fast path: no accumulator scratch, direct store.  If additionally
        # TN == N, the W index_map is constant -> W fetched from HBM once.
        kernel = functools.partial(_linear_nosplit_kernel, apply_relu=apply_relu)
        return pl.pallas_call(
            kernel,
            out_shape=jax.ShapeDtypeStruct((M, N), out_dtype),
            grid_spec=pltpu.PrefetchScalarGridSpec(
                num_scalar_prefetch=0,
                grid=grid_mn,
                in_specs=[
                    pl.BlockSpec((TM, K), lambda i, j: (i, 0)),   # x rows
                    pl.BlockSpec((TN, K), lambda i, j: (j, 0)),   # W (N, K)
                    pl.BlockSpec((1, TN), lambda i, j: (0, j)),   # bias
                ],
                out_specs=pl.BlockSpec((TM, TN), lambda i, j: (i, j)),
            ),
            compiler_params=pltpu.CompilerParams(
                dimension_semantics=("parallel", "parallel"),
                vmem_limit_bytes=vmem_limit_bytes,
            ),
        )(x2d, w, b2d)

    # General path: K tiled (reduction axis last), f32 accumulator resident
    # across the K axis.
    kernel = functools.partial(_linear_ksplit_kernel, apply_relu=apply_relu)
    grid = grid_mn + (K // TK,)
    return pl.pallas_call(
        kernel,
        out_shape=jax.ShapeDtypeStruct((M, N), out_dtype),
        grid_spec=pltpu.PrefetchScalarGridSpec(
            num_scalar_prefetch=0,
            grid=grid,
            in_specs=[
                pl.BlockSpec((TM, TK), lambda i, j, k: (i, k)),
                pl.BlockSpec((TN, TK), lambda i, j, k: (j, k)),
                pl.BlockSpec((1, TN), lambda i, j, k: (0, j)),
            ],
            out_specs=pl.BlockSpec((TM, TN), lambda i, j, k: (i, j)),
            scratch_shapes=[pltpu.VMEM((TM, TN), jnp.float32)],
        ),
        compiler_params=pltpu.CompilerParams(
            dimension_semantics=("parallel", "parallel", "arbitrary"),
            vmem_limit_bytes=vmem_limit_bytes,
        ),
    )(x2d, w, b2d)


# ----------------------------------------------------------------------------
# Fused whole-MLP kernel (weights VMEM-resident, activations never hit HBM)
# ----------------------------------------------------------------------------

def _fused_mlp_kernel(x_ref, *refs, n_layers):
    """Runs the whole stack on one (TM, ...) row tile.

    refs = (W_0, b_0, ..., W_{n-1}, b_{n-1}, o_ref); last layer has no ReLU.
    """
    o_ref = refs[-1]
    h = x_ref[...]
    for li in range(n_layers):
        w_ref = refs[2 * li]
        b_ref = refs[2 * li + 1]
        y = lax.dot_general(
            h.astype(w_ref.dtype), w_ref[...],
            dimension_numbers=(((1,), (1,)), ((), ())),
            preferred_element_type=jnp.float32,
        )
        y = y + b_ref[...].astype(jnp.float32)
        if li < n_layers - 1:
            y = jnp.maximum(y, 0.0)
        h = y
    o_ref[...] = h.astype(o_ref.dtype)


def _mlp_fused_pallas(x2d, padded_params, out_dtype, *, tm_cap=512,
                      vmem_limit_bytes=48 * 1024 * 1024):
    M, K0 = x2d.shape
    TM = M if M <= tm_cap else tm_cap
    n_layers = len(padded_params)
    N_out = padded_params[-1][0].shape[0]

    in_specs = [pl.BlockSpec((TM, K0), lambda i: (i, 0))]
    args = [x2d]
    for (W, b2d) in padded_params:
        # Full-array blocks with constant index_map -> fetched once, resident.
        in_specs.append(pl.BlockSpec(W.shape, lambda i: (0, 0)))
        in_specs.append(pl.BlockSpec(b2d.shape, lambda i: (0, 0)))
        args.extend((W, b2d))

    kernel = functools.partial(_fused_mlp_kernel, n_layers=n_layers)
    return pl.pallas_call(
        kernel,
        out_shape=jax.ShapeDtypeStruct((M, N_out), out_dtype),
        grid_spec=pltpu.PrefetchScalarGridSpec(
            num_scalar_prefetch=0,
            grid=(pl.cdiv(M, TM),),
            in_specs=in_specs,
            out_specs=pl.BlockSpec((TM, N_out), lambda i: (i, 0)),
        ),
        compiler_params=pltpu.CompilerParams(
            dimension_semantics=("parallel",),
            vmem_limit_bytes=vmem_limit_bytes,
        ),
    )(*args)


# ----------------------------------------------------------------------------
# Module-level forward
# ----------------------------------------------------------------------------

def _pad_mlp_params(hidden_params, fc_params, input_size, compute_dtype):
    """Zero-pad every layer's out_features to a multiple of 128 lanes (lane-
    dense outputs) and the next layer's in_features to match; padded
    activation columns stay exactly zero through the whole stack."""
    layers = list(hidden_params) + [fc_params]
    padded = []
    prev_width = input_size   # unpadded width feeding this layer
    prev_pad = input_size     # padded width produced upstream (x not padded)
    for (W, b) in layers:
        N, K = W.shape
        assert K == prev_width
        N_pad = _pad_to(N, _LANE)
        Wp = jnp.zeros((N_pad, prev_pad), compute_dtype)
        Wp = Wp.at[:N, :K].set(W.astype(compute_dtype))
        bp = jnp.zeros((1, N_pad), jnp.float32).at[0, :N].set(b)
        padded.append((Wp, bp))
        prev_width = N
        prev_pad = N_pad
    return padded, fc_params[0].shape[0]


def mlp_forward(x, hidden_params, fc_params, *, compute_dtype=jnp.float32,
                fuse_threshold_bytes=8 * 1024 * 1024):
    """Matches MLP.forward: (Linear -> ReLU) * num_layers, then fc Linear.

    compute_dtype: matmul operand dtype.  Use jnp.bfloat16 in production for
    ~2x MXU throughput and half the HBM traffic; accumulation and the
    bias/ReLU epilogue stay f32 either way.
    """
    caps = _default_caps()
    orig_shape = x.shape
    out_dtype = x.dtype
    input_size = orig_shape[-1]
    x2d = x.reshape(-1, input_size).astype(compute_dtype)
    M = x2d.shape[0]

    padded, output_size = _pad_mlp_params(hidden_params, fc_params,
                                          input_size, compute_dtype)

    # If every (padded) weight plus the double-buffered row tiles fit in one
    # VMEM budget, run the whole stack in a single pallas_call: weights stay
    # resident and activations never round-trip through HBM between layers.
    itemsize = jnp.dtype(compute_dtype).itemsize
    w_bytes = sum(W.size * W.dtype.itemsize + b.size * 4 for (W, b) in padded)
    tm_f = M if M <= caps["tm_cap"] else caps["tm_cap"]
    act_bytes = 2 * tm_f * (input_size + padded[-1][0].shape[0]) * itemsize
    if w_bytes + act_bytes <= fuse_threshold_bytes:
        y = _mlp_fused_pallas(x2d, padded, out_dtype,
                              tm_cap=caps["tm_cap"],
                              vmem_limit_bytes=caps["vmem_limit_bytes"])
    else:
        h = x2d
        n_layers = len(padded)
        for li, (W, b2d) in enumerate(padded):
            last = li == n_layers - 1
            h = linear_pallas(
                h, W, b2d.reshape(-1), apply_relu=not last,
                out_dtype=out_dtype if last else compute_dtype,
                tm_cap=caps["tm_cap"], tn_cap=caps["tn_cap"],
                tk_cap=caps["tk_cap"],
                vmem_limit_bytes=caps["vmem_limit_bytes"])
        y = h

    y = y[:, :output_size]  # drop the lane padding of the final projection
    return y.reshape(*orig_shape[:-1], output_size)


def _init_linear(key, in_features, out_features):
    """Mimic nn.Linear default init: U(-1/sqrt(fan_in), 1/sqrt(fan_in))."""
    kw, kb = jax.random.split(key)
    bound = 1.0 / (in_features ** 0.5)
    W = jax.random.uniform(kw, (out_features, in_features), jnp.float32,
                           minval=-bound, maxval=bound)
    b = jax.random.uniform(kb, (out_features,), jnp.float32,
                           minval=-bound, maxval=bound)
    return W, b


if __name__ == "__main__":
    # Module hyperparams (small, consistent with the PyTorch module).
    input_size, hidden_size, num_layers, output_size = 32, 64, 1, 16
    batch, seq = 2, 8

    key = jax.random.PRNGKey(0)
    kx, *kparams = jax.random.split(key, 2 + num_layers)

    hidden_params = [_init_linear(kparams[0], input_size, hidden_size)]
    for li in range(1, num_layers):
        hidden_params.append(_init_linear(kparams[li], hidden_size, hidden_size))
    fc_params = _init_linear(kparams[num_layers], hidden_size, output_size)

    x = jax.random.normal(kx, (batch, seq, input_size), jnp.float32)

    # Plain-JAX reference of the same forward pass.
    h_ref = x
    for (W, bvec) in hidden_params:
        h_ref = jnp.maximum(h_ref @ W.T + bvec, 0.0)
    W_fc, b_fc = fc_params
    y_ref = h_ref @ W_fc.T + b_fc

    # 1) Fused single-pallas_call path (picked automatically at these shapes).
    y_fused = mlp_forward(x, hidden_params, fc_params)
    jax.block_until_ready(y_fused)
    assert y_fused.shape == (batch, seq, output_size)
    assert jnp.allclose(y_fused, y_ref, atol=1e-5, rtol=1e-5)

    # 2) Per-layer tiled path (what wide layers / large batches use), f32.
    y_layered = mlp_forward(x, hidden_params, fc_params, fuse_threshold_bytes=0)
    jax.block_until_ready(y_layered)
    assert y_layered.shape == (batch, seq, output_size)
    assert jnp.allclose(y_layered, y_ref, atol=1e-5, rtol=1e-5)

    # 3) Per-layer path with bf16 operands / f32 accumulation (production
    #    dtype recommendation); looser tolerance vs the f32 reference.
    y_bf16 = mlp_forward(x, hidden_params, fc_params,
                         compute_dtype=jnp.bfloat16, fuse_threshold_bytes=0)
    jax.block_until_ready(y_bf16)
    assert y_bf16.shape == (batch, seq, output_size)
    assert jnp.allclose(y_bf16, y_ref, atol=5e-2, rtol=5e-2)

    print("KERNEL_OK")
</pallas_src>

<mosaic_0001>
module attributes {stable_mosaic.version = 11 : i64} {
  func.func @_fused_mlp_kernel(%arg0: i32, %arg1: memref<16x32xf32, #tpu.memory_space<vmem>>, %arg2: memref<128x32xf32, #tpu.memory_space<vmem>>, %arg3: memref<1x128xf32, #tpu.memory_space<vmem>>, %arg4: memref<128x128xf32, #tpu.memory_space<vmem>>, %arg5: memref<1x128xf32, #tpu.memory_space<vmem>>, %arg6: memref<16x128xf32, #tpu.memory_space<vmem>>) attributes {dimension_semantics = [#tpu.dimension_semantics<parallel>], iteration_bounds = array<i64: 1>, scalar_prefetch = 0 : i64, scratch_operands = 0 : i64, tpu.core_type = #tpu.core_type<tc>, window_params = [{transform_indices = @transform_0, window_bounds = array<i64: 16, 32>}, {pipeline_mode = #tpu.pipeline_mode<synchronous>, transform_indices = @transform_1, window_bounds = array<i64: 128, 32>}, {pipeline_mode = #tpu.pipeline_mode<synchronous>, transform_indices = @transform_2, window_bounds = array<i64: 1, 128>}, {pipeline_mode = #tpu.pipeline_mode<synchronous>, transform_indices = @transform_3, window_bounds = array<i64: 128, 128>}, {pipeline_mode = #tpu.pipeline_mode<synchronous>, transform_indices = @transform_4, window_bounds = array<i64: 1, 128>}, {transform_indices = @transform_5, window_bounds = array<i64: 16, 128>}]} {
    %c0 = arith.constant 0 : index
    %c0_0 = arith.constant 0 : index
    %0 = vector.load %arg1[%c0, %c0_0] : memref<16x32xf32, #tpu.memory_space<vmem>>, vector<16x32xf32>
    %c0_1 = arith.constant 0 : index
    %c0_2 = arith.constant 0 : index
    %1 = vector.load %arg2[%c0_1, %c0_2] : memref<128x32xf32, #tpu.memory_space<vmem>>, vector<128x32xf32>
    %cst = arith.constant dense<0.000000e+00> : vector<16x128xf32>
    %2 = tpu.matmul %0, %1, %cst {dimension_numbers = #tpu.dot_dimension_numbers<[1], [1], [0], [0], [0, 0, 1, 0], [], []>} : vector<16x32xf32>, vector<128x32xf32>, vector<16x128xf32> -> vector<16x128xf32>
    %c0_3 = arith.constant 0 : index
    %c0_4 = arith.constant 0 : index
    %3 = vector.load %arg3[%c0_3, %c0_4] : memref<1x128xf32, #tpu.memory_space<vmem>>, vector<1x128xf32>
    %4 = vector.broadcast %3 : vector<1x128xf32> to vector<16x128xf32>
    %5 = arith.addf %2, %4 : vector<16x128xf32>
    %cst_5 = arith.constant 0.000000e+00 : f32
    %6 = vector.broadcast %cst_5 : f32 to vector<16x128xf32>
    %7 = arith.maximumf %5, %6 : vector<16x128xf32>
    %c0_6 = arith.constant 0 : index
    %c0_7 = arith.constant 0 : index
    %8 = vector.load %arg4[%c0_6, %c0_7] : memref<128x128xf32, #tpu.memory_space<vmem>>, vector<128x128xf32>
    %cst_8 = arith.constant dense<0.000000e+00> : vector<16x128xf32>
    %9 = tpu.matmul %7, %8, %cst_8 {dimension_numbers = #tpu.dot_dimension_numbers<[1], [1], [0], [0], [0, 0, 1, 0], [], []>} : vector<16x128xf32>, vector<128x128xf32>, vector<16x128xf32> -> vector<16x128xf32>
    %c0_9 = arith.constant 0 : index
    %c0_10 = arith.constant 0 : index
    %10 = vector.load %arg5[%c0_9, %c0_10] : memref<1x128xf32, #tpu.memory_space<vmem>>, vector<1x128xf32>
    %11 = vector.broadcast %10 : vector<1x128xf32> to vector<16x128xf32>
    %12 = arith.addf %9, %11 : vector<16x128xf32>
    %c0_11 = arith.constant 0 : index
    %c0_12 = arith.constant 0 : index
    %13 = vector.load %arg6[%c0_11, %c0_12] : memref<16x128xf32, #tpu.memory_space<vmem>>, vector<16x128xf32>
    tpu.vector_store %arg6[%c0_11, %c0_12], %12 {strides = array<i32>} : memref<16x128xf32, #tpu.memory_space<vmem>>, vector<16x128xf32>,
    return
  }
  func.func @transform_0(%arg0: i32) -> (i32, i32) {
    %c0_i32 = arith.constant 0 : i32
    %c0_i32_0 = arith.constant 0 : i32
    return %arg0, %c0_i32 : i32, i32
  }
  func.func @transform_1(%arg0: i32) -> (i32, i32) {
    %c0_i32 = arith.constant 0 : i32
    %c0_i32_0 = arith.constant 0 : i32
    %c0_i32_1 = arith.constant 0 : i32
    return %c0_i32, %c0_i32_0 : i32, i32
  }
  func.func @transform_2(%arg0: i32) -> (i32, i32) {
    %c0_i32 = arith.constant 0 : i32
    %c0_i32_0 = arith.constant 0 : i32
    %c0_i32_1 = arith.constant 0 : i32
    return %c0_i32, %c0_i32_0 : i32, i32
  }
  func.func @transform_3(%arg0: i32) -> (i32, i32) {
    %c0_i32 = arith.constant 0 : i32
    %c0_i32_0 = arith.constant 0 : i32
    %c0_i32_1 = arith.constant 0 : i32
    return %c0_i32, %c0_i32_0 : i32, i32
  }
  func.func @transform_4(%arg0: i32) -> (i32, i32) {
    %c0_i32 = arith.constant 0 : i32
    %c0_i32_0 = arith.constant 0 : i32
    %c0_i32_1 = arith.constant 0 : i32
    return %c0_i32, %c0_i32_0 : i32, i32
  }
  func.func @transform_5(%arg0: i32) -> (i32, i32) {
    %c0_i32 = arith.constant 0 : i32
    %c0_i32_0 = arith.constant 0 : i32
    return %arg0, %c0_i32 : i32, i32
  }
}

</mosaic_0001>

<bundles_post_ra>
// kernel: tpu_custom_call.1
= control target key start
LH: loop header
LB: loop body
LE: loop exit
PB: predicated region body
PF: predicated region fallthrough
CT: control target
= control target key end

     0   :  { %vm46_vm0 = vcmask 261120   ;;  %s720_s0 = inlined_call_operand.vmem [shape: f32[16,32], index: 0, kind: input, shape index: {}]   ;;  %s721_s1 = inlined_call_operand.vmem [shape: f32[128,32], index: 1, kind: input, shape index: {}]   ;;  %s722_s2 = inlined_call_operand.vmem [shape: f32[1,128], index: 2, kind: input, shape index: {}]   ;;  %s723_s3 = inlined_call_operand.vmem [shape: f32[128,128], index: 3, kind: input, shape index: {}]   ;;  %s724_s4 = inlined_call_operand.vmem [shape: f32[1,128], index: 4, kind: input, shape index: {}]   ;;  %s725_s5 = inlined_call_operand.hbm [shape: f32[16,128], index: 5, kind: output, shape index: {}]  }
   0x1   :  { %v23_v0 = vld [vmem:[%s721_s1] sm:$0xff]  ;;  %v24_v1 = vld [vmem:[%s721_s1 + $0x8] sm:$0xff]  ;;  %v25_v2 = vld [vmem:[%s721_s1 + $0x10] sm:$0xff] }
   0x2   :  { %v420_v3 = vpack.c.bf16 %v24_v1, %v23_v0  ;;  %vm571_vm1 = vmpackc.low %vm46_vm0, %vm46_vm0  ;;  %v26_v5 = vld [vmem:[%s721_s1 + $0x18] sm:$0xff]  ;;  %v27_v7 = vld [vmem:[%s721_s1 + $0x20] sm:$0xff] }
   0x3   :  { %v426_v6 = vpack.c.bf16 %v26_v5, %v25_v2  ;;  %v21_v8 = vld [vmem:[%s720_s0] sm:$0xff]  ;;  %v28_v9 = vld [vmem:[%s721_s1 + $0x28] sm:$0xff]  ;;  %v180_v13 = vld [vmem:[%s723_s3 + $0x10] sm:$0xff] }
   0x4   :  { %422 = vmatprep.subr.msk.bf16.mxu0 %vm571_vm1, %v420_v3  ;;  %382 = vmatprep.mubr.msk.f32.mxu0 %vm46_vm0, %v21_v8  ;;  %v178_v10 = vld [vmem:[%s723_s3] sm:$0xff]  ;;  %v179_v11 = vld [vmem:[%s723_s3 + $0x8] sm:$0xff]  ;;  %v181_v14 = vld [vmem:[%s723_s3 + $0x18] sm:$0xff]  ;;  %v432_v16 = vpack.c.bf16 %v28_v9, %v27_v7 }
   0x5   :  { %425 = vmatpush3.bf16.xpose.msk.msra.mxu0 %vm571_vm1, %v420_v3  ;;  %v468_v12 = vpack.c.bf16 %v179_v11, %v178_v10  ;;  %v472_v15 = vpack.c.bf16 %v181_v14, %v180_v13 }
   0x6   :  { %428 = vmatprep.subr.msk.bf16.mxu0 %vm571_vm1, %v426_v6 }
   0x7   :  { %469 = vmatprep.subr.bf16.mxu1 %v468_v12 }
   0x8   :  { %471 = vmatpush3.bf16.xpose.msra.mxu1 %v468_v12 }
   0x9   :  { %473 = vmatprep.subr.bf16.mxu1 %v472_v15 }
   0xa   :  { %10 = vsyncpa [#allocation3], 0  ;;  %v182_v17 = vld [vmem:[%s723_s3 + $0x20] sm:$0xff]  ;;  %v183_v18 = vld [vmem:[%s723_s3 + $0x28] sm:$0xff] }
   0xb   :  { %v29_v19 = vld [vmem:[%s721_s1 + $0x30] sm:$0xff]  ;;  %v30_v20 = vld [vmem:[%s721_s1 + $0x38] sm:$0xff]  ;;  %v476_v21 = vpack.c.bf16 %v183_v18, %v182_v17  ;;  %v31_v25 = vld [vmem:[%s721_s1 + $0x40] sm:$0xff] }
   0xc   :  { %v438_v22 = vpack.c.bf16 %v30_v20, %v29_v19  ;;  %v184_v23 = vld [vmem:[%s723_s3 + $0x30] sm:$0xff]  ;;  %v185_v24 = vld [vmem:[%s723_s3 + $0x38] sm:$0xff]  ;;  %v32_v26 = vld [vmem:[%s721_s1 + $0x48] sm:$0xff] }
   0xd   :  { %431 = vmatpush3.bf16.xpose.msk.msra.mxu0 %vm571_vm1, %v426_v6  ;;  %v480_v27 = vpack.c.bf16 %v185_v24, %v184_v23  ;;  %v444_v28 = vpack.c.bf16 %v32_v26, %v31_v25  ;;  %v186_v29 = vld [vmem:[%s723_s3 + $0x40] sm:$0xff]  ;;  %v187_v30 = vld [vmem:[%s723_s3 + $0x48] sm:$0xff]  ;;  %v33_v31 = vld [vmem:[%s721_s1 + $0x50] sm:$0xff] }
   0xe   :  { %434 = vmatprep.subr.msk.bf16.mxu0 %vm571_vm1, %v432_v16  ;;  %v34_v32 = vld [vmem:[%s721_s1 + $0x58] sm:$0xff]  ;;  %v484_v33 = vpack.c.bf16 %v187_v30, %v186_v29  ;;  %v188_v35 = vld [vmem:[%s723_s3 + $0x50] sm:$0xff]  ;;  %v35_v37 = vld [vmem:[%s721_s1 + $0x60] sm:$0xff] }
   0xf   :  { %v450_v34 = vpack.c.bf16 %v34_v32, %v33_v31  ;;  %v189_v36 = vld [vmem:[%s723_s3 + $0x58] sm:$0xff]  ;;  %v36_v38 = vld [vmem:[%s721_s1 + $0x68] sm:$0xff]  ;;  %v190_v41 = vld [vmem:[%s723_s3 + $0x60] sm:$0xff] }
  0x10   :  { %475 = vmatpush3.bf16.xpose.msra.mxu1 %v472_v15  ;;  %v488_v39 = vpack.c.bf16 %v189_v36, %v188_v35  ;;  %v456_v40 = vpack.c.bf16 %v36_v38, %v35_v37  ;;  %v191_v42 = vld [vmem:[%s723_s3 + $0x68] sm:$0xff]  ;;  %v37_v43 = vld [vmem:[%s721_s1 + $0x70] sm:$0xff]  ;;  %v38_v44 = vld [vmem:[%s721_s1 + $0x78] sm:$0xff] }
  0x11   :  { %477 = vmatprep.subr.bf16.mxu1 %v476_v21  ;;  %v492_v45 = vpack.c.bf16 %v191_v42, %v190_v41  ;;  %v462_v46 = vpack.c.bf16 %v38_v44, %v37_v43  ;;  %v192_v47 = vld [vmem:[%s723_s3 + $0x70] sm:$0xff]  ;;  %v193_v48 = vld [vmem:[%s723_s3 + $0x78] sm:$0xff]  ;;  %v22_v50 = vld [vmem:[%s720_s0 + $0x8] sm:$0xff]  ;;  %s527_s0 = smov [#allocation2]  }
  0x12   :  { %v496_v49 = vpack.c.bf16 %v193_v48, %v192_v47  ;;  %v294_v51 = vld [vmem:[%s722_s2] ss:$0 sm:$0xff]  ;;  %s283_s13 = sshll.u32 %s527_s0, 4  ;;  %s284_s13 = int_to_ptr.vmem [resolvable:$true] %s283_s13 }
  0x13   :  { %v313_v58 = vld [vmem:[%s724_s4] ss:$0 sm:$0xff]  ;;  %s503_s2 = scalar_lea.vmem %s284_s13, 256  ;;  %p508_p1 = scmp.lt.s32.totalorder %s284_s13, %s284_s13 }
  0x14   :  { %p504_p0 = scmp.ne.s32.totalorder %s284_s13, %s503_s2  ;;  %p509_p2 = scmp.lt.s32.totalorder %s503_s2, %s503_s2 }
  0x15   :  { %437 = vmatpush3.bf16.xpose.msk.msra.mxu0 %vm571_vm1, %v432_v16 }
  0x16   :  { %440 = vmatprep.subr.msk.bf16.mxu0 %vm571_vm1, %v438_v22  ;;  %p510_p3 = por %p509_p2, %p508_p1 }
  0x18   :  { %479 = vmatpush3.bf16.xpose.msra.mxu1 %v476_v21  ;;  %p511_p4 = pnand %p510_p3, %p504_p0 }
  0x19   :  { %481 = vmatprep.subr.bf16.mxu1 %v480_v27 }
  0x1d   :  { %443 = vmatpush3.bf16.xpose.msk.msra.mxu0 %vm571_vm1, %v438_v22 }
  0x1e   :  { %446 = vmatprep.subr.msk.bf16.mxu0 %vm571_vm1, %v444_v28 }
  0x20   :  { %483 = vmatpush3.bf16.xpose.msra.mxu1 %v480_v27 }
  0x21   :  { %485 = vmatprep.subr.bf16.mxu1 %v484_v33 }
  0x25   :  { %449 = vmatpush3.bf16.xpose.msk.msra.mxu0 %vm571_vm1, %v444_v28 }
  0x26   :  { %452 = vmatprep.subr.msk.bf16.mxu0 %vm571_vm1, %v450_v34 }
  0x28   :  { %487 = vmatpush3.bf16.xpose.msra.mxu1 %v484_v33 }
  0x29   :  { %489 = vmatprep.subr.bf16.mxu1 %v488_v39 }
  0x2d   :  { %455 = vmatpush3.bf16.xpose.msk.msra.mxu0 %vm571_vm1, %v450_v34 }
  0x2e   :  { %458 = vmatprep.subr.msk.bf16.mxu0 %vm571_vm1, %v456_v40 }
  0x30   :  { %491 = vmatpush3.bf16.xpose.msra.mxu1 %v488_v39 }
  0x31   :  { %493 = vmatprep.subr.bf16.mxu1 %v492_v45 }
  0x35   :  { %461 = vmatpush3.bf16.xpose.msk.msra.mxu0 %vm571_vm1, %v456_v40 }
  0x36   :  { %464 = vmatprep.subr.msk.bf16.mxu0 %vm571_vm1, %v462_v46 }
  0x38   :  { %495 = vmatpush3.bf16.xpose.msra.mxu1 %v492_v45 }
  0x39   :  { %497 = vmatprep.subr.bf16.mxu1 %v496_v49 }
  0x3d   :  { %467 = vmatpush3.bf16.xpose.msk.msra.mxu0 %vm571_vm1, %v462_v46 }
  0x40   :  { %499 = vmatpush3.bf16.xpose.msra.mxu1 %v496_v49 }
  0x44   :  { %383 = vmatmul.mubr.msk.f32.vlgmr.msra.gmra.mrb[0].mxu0 %vm46_vm0, %v22_v50 }
 0x117   :  { %v384_v52 = vpop.f32.mrb[0].mxu0 }
 0x118   :  { %v173_v53 = vadd.f32 %v384_v52, %v294_v51  ;;  %v167_v54 = vpop.f32.mrb[1].mxu0 }
 0x119   :  { %v168_v55 = vadd.f32 %v294_v51, %v167_v54 }
 0x11a   :  { %v177_v57 = vmax.f32 %v173_v53, 0.0 }
 0x11b   :  { %v176_v56 = vmax.f32 %v168_v55, 0.0 }
 0x11d   :  { %417 = vmatprep.mubr.f32.mxu1 %v176_v56 }
 0x11e   :  { %418 = vmatmul.mubr.f32.vlgmr.msra.gmra.mrb[0].mxu1 %v177_v57 }
 0x1f1   :  { %v419_v59 = vpop.f32.mrb[0].mxu1 }
 0x1f2   :  { %v273_v60 = vadd.f32 %v419_v59, %v313_v58  ;;  %v267_v61 = vpop.f32.mrb[1].mxu1 }
 0x1f3   :  { %v268_v62 = vadd.f32 %v313_v58, %v267_v61 }
 0x1f4   :  { %277 = vst [vmem:[#allocation2 + $0x8] sm:$0xff] %v273_v60 }
 0x1f5   :  { %276 = vst [vmem:[#allocation2] sm:$0xff] %v268_v62 }
 0x1f6   :  { %514 = shalt.err (!%p511_p4)
}
 0x1f7   :  { %s515_s4 = scalar_lea.hbm %s725_s5, 256 }
 0x1f8   :  { %p516_p5 = scmp.ne.s32.totalorder %s725_s5, %s515_s4  ;;  %p519_p6 = scmp.lt.u32.totalorder %s515_s4, %s725_s5 }
 0x1fa   :  { %p521_p7 = pnand %p519_p6, %p516_p5 }
 0x1fc   :  { %524 = shalt.err (!%p521_p7)
}
 0x1fd   :  { %s528_s20 = smov 128   ;;  %s529_s21 = smov 8  }
 0x1fe   :  { %289 = dma.vmem_to_hbm [thread:$0]  %s284_s13, 256, %s725_s5, [#allocation3], %s528_s20, %s528_s20, %s529_s21  }
 0x1ff   :  { %525 = dma.done.wait [#allocation3], 256  }
 0x200   :  { %526 = vsyncadd [#allocation3], 4294967040 }
 0x201   :  { %293 = vsyncpa [#allocation3], 1 }

</bundles_post_ra>
